<compile_context>
chip_gen: v6e
topology: v6e:2x2x1
jax: 0.10.0
libtpu: 0.0.40
codegen_flags: <defaults>
</compile_context>

<pallas_src>
import functools

import jax
import jax.numpy as jnp
from jax import lax
from jax.experimental import pallas as pl
from jax.experimental.pallas import tpu as pltpu


def _round_up(n, m):
    return ((n + m - 1) // m) * m


def _leaky_relu(x, negative_slope):
    return jnp.where(x >= 0.0, x, negative_slope * x)


def cost_estimator_kernel(x_ref, w1_ref, b1_ref, *rest, depth, negative_slope, scale):
    """x_ref: (TB, D) batch tile.  Weights are PyTorch-style (out, in); biases (out, 1).

    Internally activations live as (features, TB): the batch sits on the 128-wide lane
    axis, so every elementwise op / bias broadcast runs on full vregs and intermediates
    are not lane-padded in VMEM.
    """
    if depth > 1:
        wh_ref, bh_ref, wp_ref, bp_ref, wl_ref, bl_ref, o_ref = rest
    else:
        wp_ref, bp_ref, wl_ref, bl_ref, o_ref = rest

    def dense(w, b, h):
        # MXU matmul in the (possibly bf16) weight dtype, f32 accumulation,
        # f32 bias broadcast along the lane (batch) axis.
        return jnp.dot(w, h.astype(w.dtype), preferred_element_type=jnp.float32) + b

    # fc1: contract dim 1 of W1 (H, D) with dim 1 of the x tile (TB, D) -> (H, TB).
    # The input affine 4*(x - 0.5) is folded into w1/b1 at pack time.
    h = lax.dot_general(
        w1_ref[...], x_ref[...].astype(w1_ref.dtype),
        dimension_numbers=(((1,), (1,)), ((), ())),
        preferred_element_type=jnp.float32) + b1_ref[...]
    h = _leaky_relu(h, negative_slope)

    # hidden layers (dropout == identity in eval) + leaky_relu
    for i in range(depth - 1):
        h = _leaky_relu(dense(wh_ref[i], bh_ref[i], h), negative_slope)

    # fc_prelast (+ dropout identity) + leaky_relu
    h = _leaky_relu(dense(wp_ref[...], bp_ref[...], h), negative_slope)

    # fc_last + 2*tanh(scale*y): computed lane-dense as (out_dim, TB), then a tiny
    # in-kernel (XLU) transpose so the store matches the (TB, out_dim) output block.
    yT = dense(wl_ref[...], bl_ref[...], h)
    outT = 2.0 * jnp.tanh(yT * scale)
    o_ref[...] = jnp.transpose(outT).astype(o_ref.dtype)


def cost_estimator_forward(x, packed, *, depth, negative_slope=0.01, scale=1.5,
                           block_b=2048):
    """x: (B, input_dim) f32 or bf16.  packed: see pack_params().  Returns (B, out_dim) f32."""
    B, D = x.shape
    H = packed["w1"].shape[0]
    out_dim = packed["wl"].shape[0]
    assert block_b % 128 == 0

    # Lane-aligned batch tile, capped at block_b, with >= 2 grid steps whenever B > 128
    # so the ("parallel",) axis can split across both v7x TensorCores.  The last block
    # may overhang B; Pallas masks the out-of-bounds output rows (no jnp.pad pre-pass).
    TB = min(block_b, max(128, _round_up(pl.cdiv(B, 2), 128)))
    grid_b = pl.cdiv(B, TB)

    nh = depth - 1
    args = [x, packed["w1"], packed["b1"]]
    in_specs = [
        # x streamed as contiguous (TB, D) tiles straight from the (B, D) array.
        pl.BlockSpec((TB, D), lambda i: (i, 0)),
        # Weights/biases: constant index_map -> DMA'd once, VMEM-resident across steps.
        pl.BlockSpec((H, D), lambda i: (0, 0)),
        pl.BlockSpec((H, 1), lambda i: (0, 0)),
    ]
    if nh > 0:
        args += [packed["wh"], packed["bh"]]
        in_specs += [
            pl.BlockSpec((nh, H, H), lambda i: (0, 0, 0)),
            pl.BlockSpec((nh, H, 1), lambda i: (0, 0, 0)),
        ]
    args += [packed["wp"], packed["bp"], packed["wl"], packed["bl"]]
    in_specs += [
        pl.BlockSpec((H, H), lambda i: (0, 0)),
        pl.BlockSpec((H, 1), lambda i: (0, 0)),
        pl.BlockSpec((out_dim, H), lambda i: (0, 0)),
        pl.BlockSpec((out_dim, 1), lambda i: (0, 0)),
    ]

    kernel = functools.partial(
        cost_estimator_kernel, depth=depth,
        negative_slope=negative_slope, scale=scale)

    w_bytes = sum(int(a.size) * int(a.dtype.itemsize) for a in args[1:])
    cost = pl.CostEstimate(
        flops=int(2 * B * (D * H + depth * H * H + H * out_dim)),
        transcendentals=int(B * out_dim),
        bytes_accessed=int(B * D * x.dtype.itemsize + B * out_dim * 4 + w_bytes),
    )

    return pl.pallas_call(
        kernel,
        out_shape=jax.ShapeDtypeStruct((B, out_dim), jnp.float32),
        grid=(grid_b,),
        in_specs=in_specs,
        out_specs=pl.BlockSpec((TB, out_dim), lambda i: (i, 0)),
        compiler_params=pltpu.CompilerParams(
            dimension_semantics=("parallel",)),      # megacore shard on v7x
        cost_estimate=cost,
    )(*args)


def init_params(key, input_dim, hidden_size, output_dim, depth):
    """PyTorch-style uniform(-1/sqrt(fan_in)) init; weights stored (out, in)."""
    assert depth >= 1
    ks = jax.random.split(key, 8)

    def lin(kw, kb, fan_in, fan_out):
        bound = 1.0 / float(fan_in) ** 0.5
        w = jax.random.uniform(kw, (fan_out, fan_in), jnp.float32, -bound, bound)
        b = jax.random.uniform(kb, (fan_out,), jnp.float32, -bound, bound)
        return w, b

    w1, b1 = lin(ks[0], ks[1], input_dim, hidden_size)
    wh = bh = None
    if depth > 1:
        hk = jax.random.split(ks[2], 2 * (depth - 1))
        wh_list, bh_list = [], []
        for i in range(depth - 1):
            w, b = lin(hk[2 * i], hk[2 * i + 1], hidden_size, hidden_size)
            wh_list.append(w)
            bh_list.append(b)
        wh = jnp.stack(wh_list, axis=0)        # (depth-1, H, H)
        bh = jnp.stack(bh_list, axis=0)        # (depth-1, H)
    wp, bp = lin(ks[3], ks[4], hidden_size, hidden_size)
    wl, bl = lin(ks[5], ks[6], hidden_size, output_dim)
    return {"w1": w1, "b1": b1, "wh": wh, "bh": bh,
            "wp": wp, "bp": bp, "wl": wl, "bl": bl}


def pack_params(params, *, use_bf16=True):
    """Fold 4*(x-0.5) into fc1, reshape biases to (out,1), cast MXU weights."""
    mm = jnp.bfloat16 if use_bf16 else jnp.float32
    w1, b1 = params["w1"], params["b1"]
    w1f = 4.0 * w1                                           # fold the scale
    b1f = b1 - 2.0 * jnp.sum(w1, axis=1)                     # fold the shift
    packed = {
        "w1": w1f.astype(mm), "b1": b1f.reshape(-1, 1),
        "wp": params["wp"].astype(mm), "bp": params["bp"].reshape(-1, 1),
        "wl": params["wl"].astype(mm), "bl": params["bl"].reshape(-1, 1),
    }
    if params["wh"] is not None:
        packed["wh"] = params["wh"].astype(mm)               # (depth-1, H, H)
        packed["bh"] = params["bh"][:, :, None]              # (depth-1, H, 1)
    return packed


def torch_reference(x, params, *, depth, negative_slope=0.01, scale=1.5):
    """Exact f32 semantics of the PyTorch module (eval mode)."""
    h = 4.0 * (x - 0.5)
    h = jnp.dot(h, params["w1"].T) + params["b1"]
    h = jnp.where(h >= 0, h, negative_slope * h)
    for i in range(depth - 1):
        h = jnp.dot(h, params["wh"][i].T) + params["bh"][i]
        h = jnp.where(h >= 0, h, negative_slope * h)
    h = jnp.dot(h, params["wp"].T) + params["bp"]
    h = jnp.where(h >= 0, h, negative_slope * h)
    y = jnp.dot(h, params["wl"].T) + params["bl"]
    return 2.0 * jnp.tanh(y * scale)


def mirrored_reference(x, packed, *, depth, negative_slope=0.01, scale=1.5):
    """Same math / cast points as the kernel (bf16 MXU operands, f32 accum)."""
    def lin(h, w, b):
        return (jnp.dot(h.astype(w.dtype), w.T, preferred_element_type=jnp.float32)
                + b.reshape(1, -1))
    h = jnp.where((t := lin(x, packed["w1"], packed["b1"])) >= 0, t, negative_slope * t)
    for i in range(depth - 1):
        t = lin(h, packed["wh"][i], packed["bh"][i])
        h = jnp.where(t >= 0, t, negative_slope * t)
    t = lin(h, packed["wp"], packed["bp"])
    h = jnp.where(t >= 0, t, negative_slope * t)
    y = lin(h, packed["wl"], packed["bl"])
    return 2.0 * jnp.tanh(y * scale)


if __name__ == "__main__":
    B, INPUT_DIM, HIDDEN, OUTPUT_DIM, DEPTH = 300, 32, 32, 16, 4

    key = jax.random.PRNGKey(0)
    k_x, k_p = jax.random.split(key)
    x = jax.random.uniform(k_x, (B, INPUT_DIM), jnp.float32)
    params = init_params(k_p, INPUT_DIM, HIDDEN, OUTPUT_DIM, DEPTH)

    # 1) f32 variant: must match the PyTorch-semantics reference tightly.
    #    B=300 -> TB=256, grid=2 with a ragged final block (exercises weight
    #    residency + boundary masking, no padding / transposes in the wrapper).
    packed32 = pack_params(params, use_bf16=False)
    out32 = jax.block_until_ready(cost_estimator_forward(x, packed32, depth=DEPTH))
    ref32 = torch_reference(x, params, depth=DEPTH)
    assert out32.shape == (B, OUTPUT_DIM)
    assert jnp.allclose(out32, ref32, atol=1e-4, rtol=1e-4), "f32 mismatch vs reference"

    # 2) bf16 fast path: x streamed as bf16 (cast where produced), bf16 MXU weights,
    #    f32 accumulation/elementwise.  Compare against a reference mirroring the
    #    kernel's cast points, plus a loose sanity check vs the f32 result.
    packed16 = pack_params(params, use_bf16=True)
    x_bf16 = x.astype(jnp.bfloat16)                 # halves the dominant HBM stream
    out16 = jax.block_until_ready(cost_estimator_forward(x_bf16, packed16, depth=DEPTH))
    ref16 = mirrored_reference(x, packed16, depth=DEPTH)
    assert out16.shape == (B, OUTPUT_DIM)
    assert jnp.allclose(out16, ref16, atol=2e-3, rtol=2e-3), "bf16 mismatch vs mirrored ref"
    assert float(jnp.max(jnp.abs(out16 - ref32))) < 0.25, "bf16 drifted too far from f32"

    print("KERNEL_OK")
</pallas_src>

<mosaic_0001>
module attributes {stable_mosaic.version = 11 : i64} {
  func.func @cost_estimator_kernel(%arg0: i32, %arg1: memref<256x32xf32, #tpu.memory_space<vmem>>, %arg2: memref<32x32xf32, #tpu.memory_space<vmem>>, %arg3: memref<32x1xf32, #tpu.memory_space<vmem>>, %arg4: memref<3x32x32xf32, #tpu.memory_space<vmem>>, %arg5: memref<3x32x1xf32, #tpu.memory_space<vmem>>, %arg6: memref<32x32xf32, #tpu.memory_space<vmem>>, %arg7: memref<32x1xf32, #tpu.memory_space<vmem>>, %arg8: memref<16x32xf32, #tpu.memory_space<vmem>>, %arg9: memref<16x1xf32, #tpu.memory_space<vmem>>, %arg10: memref<256x16xf32, #tpu.memory_space<vmem>>) attributes {dimension_semantics = [#tpu.dimension_semantics<parallel>], iteration_bounds = array<i64: 2>, scalar_prefetch = 0 : i64, scratch_operands = 0 : i64, tpu.core_type = #tpu.core_type<tc>, window_params = [{transform_indices = @transform_0, window_bounds = array<i64: 256, 32>}, {pipeline_mode = #tpu.pipeline_mode<synchronous>, transform_indices = @transform_1, window_bounds = array<i64: 32, 32>}, {pipeline_mode = #tpu.pipeline_mode<synchronous>, transform_indices = @transform_2, window_bounds = array<i64: 32, 1>}, {pipeline_mode = #tpu.pipeline_mode<synchronous>, transform_indices = @transform_3, window_bounds = array<i64: 3, 32, 32>}, {pipeline_mode = #tpu.pipeline_mode<synchronous>, transform_indices = @transform_4, window_bounds = array<i64: 3, 32, 1>}, {pipeline_mode = #tpu.pipeline_mode<synchronous>, transform_indices = @transform_5, window_bounds = array<i64: 32, 32>}, {pipeline_mode = #tpu.pipeline_mode<synchronous>, transform_indices = @transform_6, window_bounds = array<i64: 32, 1>}, {pipeline_mode = #tpu.pipeline_mode<synchronous>, transform_indices = @transform_7, window_bounds = array<i64: 16, 32>}, {pipeline_mode = #tpu.pipeline_mode<synchronous>, transform_indices = @transform_8, window_bounds = array<i64: 16, 1>}, {transform_indices = @transform_9, window_bounds = array<i64: 256, 16>}]} {
    %c0 = arith.constant 0 : index
    %c0_0 = arith.constant 0 : index
    %0 = vector.load %arg2[%c0, %c0_0] : memref<32x32xf32, #tpu.memory_space<vmem>>, vector<32x32xf32>
    %c0_1 = arith.constant 0 : index
    %c0_2 = arith.constant 0 : index
    %1 = vector.load %arg1[%c0_1, %c0_2] : memref<256x32xf32, #tpu.memory_space<vmem>>, vector<256x32xf32>
    %cst = arith.constant dense<0.000000e+00> : vector<32x256xf32>
    %2 = tpu.matmul %0, %1, %cst {dimension_numbers = #tpu.dot_dimension_numbers<[1], [1], [0], [0], [0, 0, 1, 0], [], []>} : vector<32x32xf32>, vector<256x32xf32>, vector<32x256xf32> -> vector<32x256xf32>
    %c0_3 = arith.constant 0 : index
    %c0_4 = arith.constant 0 : index
    %3 = vector.load %arg3[%c0_3, %c0_4] : memref<32x1xf32, #tpu.memory_space<vmem>>, vector<32x1xf32>
    %4 = vector.broadcast %3 : vector<32x1xf32> to vector<32x256xf32>
    %5 = arith.addf %2, %4 : vector<32x256xf32>
    %cst_5 = arith.constant 0.000000e+00 : f32
    %6 = vector.broadcast %cst_5 : f32 to vector<32x256xf32>
    %7 = arith.cmpf oge, %5, %6 : vector<32x256xf32>
    %cst_6 = arith.constant 0.00999999977 : f32
    %8 = vector.broadcast %cst_6 : f32 to vector<32x256xf32>
    %9 = arith.mulf %8, %5 : vector<32x256xf32>
    %10 = arith.select %7, %5, %9 : vector<32x256xi1>, vector<32x256xf32>
    %c0_7 = arith.constant 0 : index
    %c0_8 = arith.constant 0 : index
    %c0_9 = arith.constant 0 : index
    %11 = vector.load %arg4[%c0_7, %c0_8, %c0_9] : memref<3x32x32xf32, #tpu.memory_space<vmem>>, vector<1x32x32xf32>
    %12 = vector.shape_cast %11 : vector<1x32x32xf32> to vector<32x32xf32>
    %c0_10 = arith.constant 0 : index
    %c0_11 = arith.constant 0 : index
    %c0_12 = arith.constant 0 : index
    %13 = vector.load %arg5[%c0_10, %c0_11, %c0_12] : memref<3x32x1xf32, #tpu.memory_space<vmem>>, vector<1x32x1xf32>
    %14 = vector.shape_cast %13 : vector<1x32x1xf32> to vector<32x1xf32>
    %cst_13 = arith.constant dense<0.000000e+00> : vector<32x256xf32>
    %15 = tpu.matmul %12, %10, %cst_13 {dimension_numbers = #tpu.dot_dimension_numbers<[1], [0], [0], [1], [0, 0, 1, 1], [], []>} : vector<32x32xf32>, vector<32x256xf32>, vector<32x256xf32> -> vector<32x256xf32>
    %16 = vector.broadcast %14 : vector<32x1xf32> to vector<32x256xf32>
    %17 = arith.addf %15, %16 : vector<32x256xf32>
    %cst_14 = arith.constant 0.000000e+00 : f32
    %18 = vector.broadcast %cst_14 : f32 to vector<32x256xf32>
    %19 = arith.cmpf oge, %17, %18 : vector<32x256xf32>
    %cst_15 = arith.constant 0.00999999977 : f32
    %20 = vector.broadcast %cst_15 : f32 to vector<32x256xf32>
    %21 = arith.mulf %20, %17 : vector<32x256xf32>
    %22 = arith.select %19, %17, %21 : vector<32x256xi1>, vector<32x256xf32>
    %c1 = arith.constant 1 : index
    %c0_16 = arith.constant 0 : index
    %c0_17 = arith.constant 0 : index
    %23 = vector.load %arg4[%c1, %c0_16, %c0_17] : memref<3x32x32xf32, #tpu.memory_space<vmem>>, vector<1x32x32xf32>
    %24 = vector.shape_cast %23 : vector<1x32x32xf32> to vector<32x32xf32>
    %c1_18 = arith.constant 1 : index
    %c0_19 = arith.constant 0 : index
    %c0_20 = arith.constant 0 : index
    %25 = vector.load %arg5[%c1_18, %c0_19, %c0_20] : memref<3x32x1xf32, #tpu.memory_space<vmem>>, vector<1x32x1xf32>
    %26 = vector.shape_cast %25 : vector<1x32x1xf32> to vector<32x1xf32>
    %cst_21 = arith.constant dense<0.000000e+00> : vector<32x256xf32>
    %27 = tpu.matmul %24, %22, %cst_21 {dimension_numbers = #tpu.dot_dimension_numbers<[1], [0], [0], [1], [0, 0, 1, 1], [], []>} : vector<32x32xf32>, vector<32x256xf32>, vector<32x256xf32> -> vector<32x256xf32>
    %28 = vector.broadcast %26 : vector<32x1xf32> to vector<32x256xf32>
    %29 = arith.addf %27, %28 : vector<32x256xf32>
    %cst_22 = arith.constant 0.000000e+00 : f32
    %30 = vector.broadcast %cst_22 : f32 to vector<32x256xf32>
    %31 = arith.cmpf oge, %29, %30 : vector<32x256xf32>
    %cst_23 = arith.constant 0.00999999977 : f32
    %32 = vector.broadcast %cst_23 : f32 to vector<32x256xf32>
    %33 = arith.mulf %32, %29 : vector<32x256xf32>
    %34 = arith.select %31, %29, %33 : vector<32x256xi1>, vector<32x256xf32>
    %c2 = arith.constant 2 : index
    %c0_24 = arith.constant 0 : index
    %c0_25 = arith.constant 0 : index
    %35 = vector.load %arg4[%c2, %c0_24, %c0_25] : memref<3x32x32xf32, #tpu.memory_space<vmem>>, vector<1x32x32xf32>
    %36 = vector.shape_cast %35 : vector<1x32x32xf32> to vector<32x32xf32>
    %c2_26 = arith.constant 2 : index
    %c0_27 = arith.constant 0 : index
    %c0_28 = arith.constant 0 : index
    %37 = vector.load %arg5[%c2_26, %c0_27, %c0_28] : memref<3x32x1xf32, #tpu.memory_space<vmem>>, vector<1x32x1xf32>
    %38 = vector.shape_cast %37 : vector<1x32x1xf32> to vector<32x1xf32>
    %cst_29 = arith.constant dense<0.000000e+00> : vector<32x256xf32>
    %39 = tpu.matmul %36, %34, %cst_29 {dimension_numbers = #tpu.dot_dimension_numbers<[1], [0], [0], [1], [0, 0, 1, 1], [], []>} : vector<32x32xf32>, vector<32x256xf32>, vector<32x256xf32> -> vector<32x256xf32>
    %40 = vector.broadcast %38 : vector<32x1xf32> to vector<32x256xf32>
    %41 = arith.addf %39, %40 : vector<32x256xf32>
    %cst_30 = arith.constant 0.000000e+00 : f32
    %42 = vector.broadcast %cst_30 : f32 to vector<32x256xf32>
    %43 = arith.cmpf oge, %41, %42 : vector<32x256xf32>
    %cst_31 = arith.constant 0.00999999977 : f32
    %44 = vector.broadcast %cst_31 : f32 to vector<32x256xf32>
    %45 = arith.mulf %44, %41 : vector<32x256xf32>
    %46 = arith.select %43, %41, %45 : vector<32x256xi1>, vector<32x256xf32>
    %c0_32 = arith.constant 0 : index
    %c0_33 = arith.constant 0 : index
    %47 = vector.load %arg6[%c0_32, %c0_33] : memref<32x32xf32, #tpu.memory_space<vmem>>, vector<32x32xf32>
    %c0_34 = arith.constant 0 : index
    %c0_35 = arith.constant 0 : index
    %48 = vector.load %arg7[%c0_34, %c0_35] : memref<32x1xf32, #tpu.memory_space<vmem>>, vector<32x1xf32>
    %cst_36 = arith.constant dense<0.000000e+00> : vector<32x256xf32>
    %49 = tpu.matmul %47, %46, %cst_36 {dimension_numbers = #tpu.dot_dimension_numbers<[1], [0], [0], [1], [0, 0, 1, 1], [], []>} : vector<32x32xf32>, vector<32x256xf32>, vector<32x256xf32> -> vector<32x256xf32>
    %50 = vector.broadcast %48 : vector<32x1xf32> to vector<32x256xf32>
    %51 = arith.addf %49, %50 : vector<32x256xf32>
    %cst_37 = arith.constant 0.000000e+00 : f32
    %52 = vector.broadcast %cst_37 : f32 to vector<32x256xf32>
    %53 = arith.cmpf oge, %51, %52 : vector<32x256xf32>
    %cst_38 = arith.constant 0.00999999977 : f32
    %54 = vector.broadcast %cst_38 : f32 to vector<32x256xf32>
    %55 = arith.mulf %54, %51 : vector<32x256xf32>
    %56 = arith.select %53, %51, %55 : vector<32x256xi1>, vector<32x256xf32>
    %c0_39 = arith.constant 0 : index
    %c0_40 = arith.constant 0 : index
    %57 = vector.load %arg8[%c0_39, %c0_40] : memref<16x32xf32, #tpu.memory_space<vmem>>, vector<16x32xf32>
    %c0_41 = arith.constant 0 : index
    %c0_42 = arith.constant 0 : index
    %58 = vector.load %arg9[%c0_41, %c0_42] : memref<16x1xf32, #tpu.memory_space<vmem>>, vector<16x1xf32>
    %cst_43 = arith.constant dense<0.000000e+00> : vector<16x256xf32>
    %59 = tpu.matmul %57, %56, %cst_43 {dimension_numbers = #tpu.dot_dimension_numbers<[1], [0], [0], [1], [0, 0, 1, 1], [], []>} : vector<16x32xf32>, vector<32x256xf32>, vector<16x256xf32> -> vector<16x256xf32>
    %60 = vector.broadcast %58 : vector<16x1xf32> to vector<16x256xf32>
    %61 = arith.addf %59, %60 : vector<16x256xf32>
    %cst_44 = arith.constant 1.500000e+00 : f32
    %62 = vector.broadcast %cst_44 : f32 to vector<16x256xf32>
    %63 = arith.mulf %61, %62 : vector<16x256xf32>
    %64 = math.tanh %63 : vector<16x256xf32>
    %cst_45 = arith.constant 2.000000e+00 : f32
    %65 = vector.broadcast %cst_45 : f32 to vector<16x256xf32>
    %66 = arith.mulf %65, %64 : vector<16x256xf32>
    %67 = tpu.transpose %66, [1, 0] : vector<16x256xf32> -> vector<256x16xf32>
    %c0_46 = arith.constant 0 : index
    %c0_47 = arith.constant 0 : index
    %68 = vector.load %arg10[%c0_46, %c0_47] : memref<256x16xf32, #tpu.memory_space<vmem>>, vector<256x16xf32>
    tpu.vector_store %arg10[%c0_46, %c0_47], %67 {strides = array<i32>} : memref<256x16xf32, #tpu.memory_space<vmem>>, vector<256x16xf32>,
    return
  }
  func.func @transform_0(%arg0: i32) -> (i32, i32) {
    %c0_i32 = arith.constant 0 : i32
    %c0_i32_0 = arith.constant 0 : i32
    return %arg0, %c0_i32 : i32, i32
  }
  func.func @transform_1(%arg0: i32) -> (i32, i32) {
    %c0_i32 = arith.constant 0 : i32
    %c0_i32_0 = arith.constant 0 : i32
    %c0_i32_1 = arith.constant 0 : i32
    return %c0_i32, %c0_i32_0 : i32, i32
  }
  func.func @transform_2(%arg0: i32) -> (i32, i32) {
    %c0_i32 = arith.constant 0 : i32
    %c0_i32_0 = arith.constant 0 : i32
    %c0_i32_1 = arith.constant 0 : i32
    return %c0_i32, %c0_i32_0 : i32, i32
  }
  func.func @transform_3(%arg0: i32) -> (i32, i32, i32) {
    %c0_i32 = arith.constant 0 : i32
    %c0_i32_0 = arith.constant 0 : i32
    %c0_i32_1 = arith.constant 0 : i32
    %c0_i32_2 = arith.constant 0 : i32
    return %c0_i32, %c0_i32_0, %c0_i32_1 : i32, i32, i32
  }
  func.func @transform_4(%arg0: i32) -> (i32, i32, i32) {
    %c0_i32 = arith.constant 0 : i32
    %c0_i32_0 = arith.constant 0 : i32
    %c0_i32_1 = arith.constant 0 : i32
    %c0_i32_2 = arith.constant 0 : i32
    return %c0_i32, %c0_i32_0, %c0_i32_1 : i32, i32, i32
  }
  func.func @transform_5(%arg0: i32) -> (i32, i32) {
    %c0_i32 = arith.constant 0 : i32
    %c0_i32_0 = arith.constant 0 : i32
    %c0_i32_1 = arith.constant 0 : i32
    return %c0_i32, %c0_i32_0 : i32, i32
  }
  func.func @transform_6(%arg0: i32) -> (i32, i32) {
    %c0_i32 = arith.constant 0 : i32
    %c0_i32_0 = arith.constant 0 : i32
    %c0_i32_1 = arith.constant 0 : i32
    return %c0_i32, %c0_i32_0 : i32, i32
  }
  func.func @transform_7(%arg0: i32) -> (i32, i32) {
    %c0_i32 = arith.constant 0 : i32
    %c0_i32_0 = arith.constant 0 : i32
    %c0_i32_1 = arith.constant 0 : i32
    return %c0_i32, %c0_i32_0 : i32, i32
  }
  func.func @transform_8(%arg0: i32) -> (i32, i32) {
    %c0_i32 = arith.constant 0 : i32
    %c0_i32_0 = arith.constant 0 : i32
    %c0_i32_1 = arith.constant 0 : i32
    return %c0_i32, %c0_i32_0 : i32, i32
  }
  func.func @transform_9(%arg0: i32) -> (i32, i32) {
    %c0_i32 = arith.constant 0 : i32
    %c0_i32_0 = arith.constant 0 : i32
    return %arg0, %c0_i32 : i32, i32
  }
}

</mosaic_0001>

<bundles_post_ra>
// kernel: tpu_custom_call.1
= control target key start
LH: loop header
LB: loop body
LE: loop exit
PB: predicated region body
PF: predicated region fallthrough
CT: control target
= control target key end

     0   :  { %s2175_s30 = smov 0   ;;  %s2177_s10 = smov 0   ;;  %s2664_s0 = inlined_call_operand.vmem [shape: f32[300,32], index: 0, kind: input, shape index: {}]   ;;  %s2665_s1 = inlined_call_operand.vmem [shape: f32[32,32], index: 1, kind: input, shape index: {}]   ;;  %s2666_s2 = inlined_call_operand.vmem [shape: f32[32,1], index: 2, kind: input, shape index: {}]   ;;  %s2667_s3 = inlined_call_operand.vmem [shape: f32[3,32,32], index: 3, kind: input, shape index: {}]   ;;  %s2668_s4 = inlined_call_operand.vmem [shape: f32[3,32,1], index: 4, kind: input, shape index: {}]   ;;  %s2669_s5 = inlined_call_operand.vmem [shape: f32[32,32], index: 5, kind: input, shape index: {}]   ;;  %s2670_s6 = inlined_call_operand.vmem [shape: f32[32,1], index: 6, kind: input, shape index: {}]   ;;  %s2671_s7 = inlined_call_operand.vmem [shape: f32[16,32], index: 7, kind: input, shape index: {}]   ;;  %s2672_s8 = inlined_call_operand.vmem [shape: f32[16,1], index: 8, kind: input, shape index: {}]   ;;  %s2673_s9 = inlined_call_operand.vmem [shape: f32[300,16], index: 9, kind: output, shape index: {}]  }
   0x1   :  { %s2179_s11 = smov 0  }
   0x2 LB: > { %s2188_s12 = sadd.s32 4294967295, %s2089_s11   ;;  %s2190_s13 = sadd.s32 1, %s2089_s11   ;;  %s2089_s11 = sphi %s2179_s11, %s2682_s11   ;;  %s2085_s10 = sphi %s2177_s10, %s2681_s10   ;;  %s2081_s30 = sphi %s2175_s30, %s2680_s30  }
   0x3   : > { %s217_s14 = ssub.s32 %s2089_s11, %s2190_s13  ;;  %s220_s15 = sadd.s32 1, %s2085_s10 }
   0x4   : > { %p218_p0 = scmp.eq.s32.totalorder %s217_s14, 0  ;;  %p230_p1 = scmp.ne.s32.totalorder %s2085_s10, %s2081_s30 }
   0x5   : > { %p231_p2 = scmp.eq.s32.totalorder %s2188_s12, 1  ;;  %p1801_p3 = scmp.ge.s32.totalorder %s2089_s11, 1 }
   0x6   : > { %s2198_s16 = scalar_select %p218_p0, %s2085_s10, %s220_s15  }
   0x7   : > { %p2200_p4 = por %p231_p2, %p230_p1  ;;  %p296_p5 = scmp.lt.s32.totalorder %s2089_s11, 3 }
   0x9   : > { %p297_p6 = pnand %p1801_p3, %p296_p5 }
   0xa   : > { %s2205_s18 = sshll.u32 (!%p297_p6), %s2188_s12, 5 }
   0xb   : > { %300 = sbr.rel (%p297_p6) target bundleno = 1634 (0x662), region = 56  ;;  %p340_p7 = scmp.lt.s32.totalorder (!%p297_p6), %s2205_s18, 37 }
  0x10   : > { %vm414_vm0 = vcmask 261120   ;;  %v2210_v0 = vld [vmem:[%s2665_s1] sm:$0xff]  ;;  %v2123_v1 = vmov 0   ;;  %v393_v2 = vld [vmem:[%s2666_s2 + $0x18] sm:$0xff]  ;;  %v391_v3 = vld [vmem:[%s2666_s2 + $0x8] sm:$0xff]  ;;  %s341_s25 = scalar_select %p340_p7, %s2205_s18, 37 }
  0x11   : > { %1927 = vmatprep.mubr.msk.f32.mxu0 %vm414_vm0, %v2210_v0  ;;  %2025 = vset.pattern.permute.xlu0 %v2123_v1  ;;  %v392_v4 = vld [vmem:[%s2666_s2 + $0x10] sm:$0xff]  ;;  %v390_v5 = vld [vmem:[%s2666_s2] sm:$0xff]  ;;  %v643_v6 = vld [vmem:[%s2668_s4 + $0x18] sm:$0xff]  ;;  %v2124_v59 = vmov 0.0   ;;  %s1892_s20 = sshll.u32 (%p2200_p4), %s2188_s12, 8 }
  0x12   : > { %411 = vperm.xlu0 %2025, %v393_v2   ;;  %2026 = vset.pattern.permute.xlu1 %v2123_v1  ;;  %s1804_s11 = sshll.u32 %s341_s25, 3  ;;  %v642_v10 = vld [vmem:[%s2668_s4 + $0x10] sm:$0xff]  ;;  %v641_v13 = vld [vmem:[%s2668_s4 + $0x8] sm:$0xff]  ;;  %v640_v14 = vld [vmem:[%s2668_s4] sm:$0xff]  ;;  %s2532_s22 = scalar_lea.vmem (%p2200_p4), %s2673_s9, %s1892_s20  }
  0x13   : > { %401 = vperm.xlu1 %2026, %v391_v3   ;;  %s2231_s19 = scalar_lea.vmem %s2664_s0, %s1804_s11  ;;  %v1852_v17 = vld [vmem:[%s2668_s4 + $0x38] sm:$0xff]  ;;  %v1851_v18 = vld [vmem:[%s2668_s4 + $0x30] sm:$0xff]  ;;  %v1850_v21 = vld [vmem:[%s2668_s4 + $0x28] sm:$0xff]  ;;  %740 = vmatprep.mubr.f32.mxu1 %v2124_v59  ;;  %s332_s11 = sand.u32 1, %s2081_s30  }
  0x14   : > { %v389_v7 = vld [vmem:[%s2231_s19 + $0xf8] sm:$0xff]  ;;  %v388_v9 = vld [vmem:[%s2231_s19 + $0xf0] sm:$0xff]  ;;  %v387_v12 = vld [vmem:[%s2231_s19 + $0xe8] sm:$0xff]  ;;  %s1802_s14 = sshll.u32 %s332_s11, 8  ;;  %s1466_s30 = ssub.s32 (%p2200_p4), 38, %s2205_s18 }
  0x15   : > { %v373_v8 = vld [vmem:[%s2231_s19 + $0x78] sm:$0xff]  ;;  %1895 = vmatprep.subr.msk.mxu0 %vm414_vm0, %v389_v7  ;;  %v372_v11 = vld [vmem:[%s2231_s19 + $0x70] sm:$0xff]  ;;  %v371_v15 = vld [vmem:[%s2231_s19 + $0x68] sm:$0xff]  ;;  %s2459_s15 = scalar_lea.vmem [#allocation2], %s1802_s14   ;;  %p1467_p8 = scmp.lt.s32.totalorder (%p2200_p4), %s1466_s30, 32 }
  0x16   : > { %406 = vperm.xlu0 %2025, %v392_v4   ;;  %1896 = vmatpush3.xpose.msk.msra.mxu0 %vm414_vm0, %v373_v8  ;;  %v386_v16 = vld [vmem:[%s2231_s19 + $0xe0] sm:$0xff]  ;;  %v385_v20 = vld [vmem:[%s2231_s19 + $0xd8] sm:$0xff]  ;;  %v384_v24 = vld [vmem:[%s2231_s19 + $0xd0] sm:$0xff] }
  0x17   : > { %396 = vperm.xlu1 %2026, %v390_v5   ;;  %1897 = vmatprep.subr.msk.mxu0 %vm414_vm0, %v388_v9  ;;  %v370_v19 = vld [vmem:[%s2231_s19 + $0x60] sm:$0xff]  ;;  %v369_v23 = vld [vmem:[%s2231_s19 + $0x58] sm:$0xff]  ;;  %v1863_v26 = vld [vmem:[%s2668_s4 + $0x50] sm:$0xff] }
  0x18   : > { %v1849_v22 = vld [vmem:[%s2668_s4 + $0x20] sm:$0xff]  ;;  %v1864_v25 = vld [vmem:[%s2668_s4 + $0x58] sm:$0xff]  ;;  %v368_v27 = vld [vmem:[%s2231_s19 + $0x50] sm:$0xff] }
  0x19   : > { %v383_v28 = vld [vmem:[%s2231_s19 + $0xc8] sm:$0xff]  ;;  %v1861_v30 = vld [vmem:[%s2668_s4 + $0x40] sm:$0xff]  ;;  %v1106_v33 = vld [vmem:[%s2670_s6 + $0x18] sm:$0xff] }
  0x1a   : > { %661 = vperm.xlu0 %2025, %v643_v6   ;;  %1898 = vmatpush3.xpose.msk.msra.mxu0 %vm414_vm0, %v372_v11  ;;  %v1862_v29 = vld [vmem:[%s2668_s4 + $0x48] sm:$0xff]  ;;  %v382_v32 = vld [vmem:[%s2231_s19 + $0xc0] sm:$0xff]  ;;  %v1105_v34 = vld [vmem:[%s2670_s6 + $0x10] sm:$0xff] }
  0x1b   : > { %656 = vperm.xlu1 %2026, %v642_v10   ;;  %1899 = vmatprep.subr.msk.mxu0 %vm414_vm0, %v387_v12  ;;  %v367_v31 = vld [vmem:[%s2231_s19 + $0x48] sm:$0xff]  ;;  %v366_v35 = vld [vmem:[%s2231_s19 + $0x40] sm:$0xff]  ;;  %v381_v36 = vld [vmem:[%s2231_s19 + $0xb8] sm:$0xff] }
  0x1c   : > { %v1104_v37 = vld [vmem:[%s2670_s6 + $0x8] sm:$0xff]  ;;  %v1103_v38 = vld [vmem:[%s2670_s6] sm:$0xff]  ;;  %v365_v39 = vld [vmem:[%s2231_s19 + $0x38] sm:$0xff] }
  0x1d   : > { %v380_v40 = vld [vmem:[%s2231_s19 + $0xb0] sm:$0xff]  ;;  %v1254_v41 = vld [vmem:[%s2672_s8] sm:$0xff]  ;;  %v1255_v42 = vld [vmem:[%s2672_s8 + $0x8] sm:$0xff] }
  0x1e   : > { %651 = vperm.xlu0 %2025, %v641_v13   ;;  %1900 = vmatpush3.xpose.msk.msra.mxu0 %vm414_vm0, %v371_v15  ;;  %v364_v43 = vld [vmem:[%s2231_s19 + $0x30] sm:$0xff]  ;;  %v379_v44 = vld [vmem:[%s2231_s19 + $0xa8] sm:$0xff]  ;;  %v378_v46 = vld [vmem:[%s2231_s19 + $0xa0] sm:$0xff] }
  0x1f   : > { %646 = vperm.xlu1 %2026, %v640_v14   ;;  %1901 = vmatprep.subr.msk.mxu0 %vm414_vm0, %v386_v16  ;;  %v363_v45 = vld [vmem:[%s2231_s19 + $0x28] sm:$0xff]  ;;  %v362_v47 = vld [vmem:[%s2231_s19 + $0x20] sm:$0xff]  ;;  %v377_v48 = vld [vmem:[%s2231_s19 + $0x98] sm:$0xff] }
  0x20   : > { %v361_v49 = vld [vmem:[%s2231_s19 + $0x18] sm:$0xff]  ;;  %v376_v50 = vld [vmem:[%s2231_s19 + $0x90] sm:$0xff]  ;;  %v375_v52 = vld [vmem:[%s2231_s19 + $0x88] sm:$0xff] }
  0x21   : > { %v360_v51 = vld [vmem:[%s2231_s19 + $0x10] sm:$0xff]  ;;  %v359_v53 = vld [vmem:[%s2231_s19 + $0x8] sm:$0xff]  ;;  %v374_v54 = vld [vmem:[%s2231_s19 + $0x80] sm:$0xff] }
  0x22   : > { %816 = vperm.xlu0 %2025, %v1852_v17   ;;  %1902 = vmatpush3.xpose.msk.msra.mxu0 %vm414_vm0, %v370_v19  ;;  %v358_v55 = vld [vmem:[%s2231_s19] sm:$0xff]  ;;  %v355_v56 = vld [vmem:[%s2665_s1 + $0x8] sm:$0xff]  ;;  %v356_v57 = vld [vmem:[%s2665_s1 + $0x10] sm:$0xff] }
  0x23   : > { %811 = vperm.xlu1 %2026, %v1851_v18   ;;  %1903 = vmatprep.subr.msk.mxu0 %vm414_vm0, %v385_v20  ;;  %v357_v58 = vld [vmem:[%s2665_s1 + $0x18] sm:$0xff] }
  0x26   : > { %806 = vperm.xlu0 %2025, %v1850_v21   ;;  %1904 = vmatpush3.xpose.msk.msra.mxu0 %vm414_vm0, %v369_v23 }
  0x27   : > { %801 = vperm.xlu1 %2026, %v1849_v22   ;;  %1905 = vmatprep.subr.msk.mxu0 %vm414_vm0, %v384_v24 }
  0x2a   : > { %971 = vperm.xlu0 %2025, %v1864_v25   ;;  %1906 = vmatpush3.xpose.msk.msra.mxu0 %vm414_vm0, %v368_v27 }
  0x2b   : > { %966 = vperm.xlu1 %2026, %v1863_v26   ;;  %1907 = vmatprep.subr.msk.mxu0 %vm414_vm0, %v383_v28 }
  0x2e   : > { %961 = vperm.xlu0 %2025, %v1862_v29   ;;  %1908 = vmatpush3.xpose.msk.msra.mxu0 %vm414_vm0, %v367_v31  ;;  %v636_v31 = vld [vmem:[%s2667_s3] sm:$0xff] }
  0x2f   : > { %956 = vperm.xlu1 %2026, %v1861_v30   ;;  %1909 = vmatprep.subr.msk.mxu0 %vm414_vm0, %v382_v32 }
  0x32   : > { %1124 = vperm.xlu0 %2025, %v1106_v33   ;;  %1910 = vmatpush3.xpose.msk.msra.mxu0 %vm414_vm0, %v366_v35  ;;  %v637_v33 = vld [vmem:[%s2667_s3 + $0x8] sm:$0xff]  ;;  %v639_v35 = vld [vmem:[%s2667_s3 + $0x18] sm:$0xff] }
  0x33   : > { %1119 = vperm.xlu1 %2026, %v1105_v34   ;;  %1911 = vmatprep.subr.msk.mxu0 %vm414_vm0, %v381_v36  ;;  %v638_v34 = vld [vmem:[%s2667_s3 + $0x10] sm:$0xff] }
  0x36   : > { %1114 = vperm.xlu0 %2025, %v1104_v37   ;;  %1912 = vmatpush3.xpose.msk.msra.mxu0 %vm414_vm0, %v365_v39 }
  0x37   : > { %1109 = vperm.xlu1 %2026, %v1103_v38   ;;  %1913 = vmatprep.subr.msk.mxu0 %vm414_vm0, %v380_v40 }
  0x3a   : > { %1258 = vperm.xlu0 %2025, %v1254_v41   ;;  %1914 = vmatpush3.xpose.msk.msra.mxu0 %vm414_vm0, %v364_v43 }
  0x3b   : > { %1263 = vperm.xlu1 %2026, %v1255_v42   ;;  %1915 = vmatprep.subr.msk.mxu0 %vm414_vm0, %v379_v44 }
  0x3e   : > { %1916 = vmatpush3.xpose.msk.msra.mxu0 %vm414_vm0, %v363_v45 }
  0x3f   : > { %1917 = vmatprep.subr.msk.mxu0 %vm414_vm0, %v378_v46 }
  0x42   : > { %1918 = vmatpush3.xpose.msk.msra.mxu0 %vm414_vm0, %v362_v47 }
  0x43   : > { %1919 = vmatprep.subr.msk.mxu0 %vm414_vm0, %v377_v48 }
  0x46   : > { %1920 = vmatpush3.xpose.msk.msra.mxu0 %vm414_vm0, %v361_v49 }
  0x47   : > { %1921 = vmatprep.subr.msk.mxu0 %vm414_vm0, %v376_v50 }
  0x4a   : > { %1922 = vmatpush3.xpose.msk.msra.mxu0 %vm414_vm0, %v360_v51 }
  0x4b   : > { %1923 = vmatprep.subr.msk.mxu0 %vm414_vm0, %v375_v52 }
  0x4e   : > { %1924 = vmatpush3.xpose.msk.msra.mxu0 %vm414_vm0, %v359_v53 }
  0x4f   : > { %1925 = vmatprep.subr.msk.mxu0 %vm414_vm0, %v374_v54 }
  0x52   : > { %1926 = vmatpush3.xpose.msk.msra.mxu0 %vm414_vm0, %v358_v55 }
  0x55   : > { %1928 = vmatmul.mubr.msk.f32.vlgmr.msra.gmra.mxu0 %vm414_vm0, %v2210_v0 }
  0x56   : > { %1929 = vmatprep.mubr.msk.f32.mxu0 %vm414_vm0, %v355_v56 }
  0x59   : > { %1930 = vmatmul.mubr.msk.f32.gmra.mxu0 %vm414_vm0, %v355_v56 }
  0x5a   : > { %1931 = vmatprep.mubr.msk.f32.mxu0 %vm414_vm0, %v356_v57 }
  0x5d   : > { %1932 = vmatmul.mubr.msk.f32.gmra.mxu0 %vm414_vm0, %v356_v57 }
  0x5e   : > { %1933 = vmatprep.mubr.msk.f32.mxu0 %vm414_vm0, %v357_v58 }
  0x61   : > { %1934 = vmatmul.mubr.msk.f32.gmra.mxu0 %vm414_vm0, %v357_v58 }
  0x8d   : > { %v412_v63 = vpop.permute.xlu0 %411 }
  0x8e   : > { %v402_v2 = vpop.permute.xlu1 %401 }
  0x91   : > { %v407_v4 = vpop.permute.xlu0 %406 }
  0x92   : > { %v397_v10 = vpop.permute.xlu1 %396 }
  0x95   : > { %v662_v40 = vpop.permute.xlu0 %661 }
  0x96   : > { %v657_v42 = vpop.permute.xlu1 %656 }
  0x99   : > { %v652_v47 = vpop.permute.xlu0 %651 }
  0x9a   : > { %v647_v50 = vpop.permute.xlu1 %646 }
 0x115   : > { %v589_v60 = vpop.f32.mrf.mxu0 }
 0x116   : > { %v590_v18 = vadd.f32 %v589_v60, %v397_v10 }
 0x117   : > { %v591_v61 = vpop.f32.mrf.mxu0 }
 0x118   : > { %v592_v13 = vadd.f32 %v591_v61, %v397_v10  ;;  %v620_v26 = vmul.f32 0.01, %v590_v18  ;;  %vm612_vm8 = vcmp.ge.f32.partialorder %v590_v18, 0.0  ;;  %v1846_v10 = vld [vmem:[%s2667_s3 + $0x28] sm:$0xff] }
 0x119   : > { %v595_v62 = vpop.f32.mrf.mxu0 }
 0x11a   : > { %v596_v14 = vadd.f32 %v595_v62, %v402_v2  ;;  %v621_v24 = vmul.f32 0.01, %v592_v13  ;;  %vm613_vm7 = vcmp.ge.f32.partialorder %v592_v13, 0.0  ;;  %v628_v32 = vsel %vm612_vm8, %v590_v18, %v620_v26 }
 0x11b   : > { %v597_v0 = vpop.f32.mrf.mxu0 }
 0x11c   : > { %v598_v11 = vadd.f32 %v597_v0, %v402_v2  ;;  %v622_v22 = vmul.f32 0.01, %v596_v14  ;;  %vm614_vm6 = vcmp.ge.f32.partialorder %v596_v14, 0.0  ;;  %v629_v30 = vsel %vm613_vm7, %v592_v13, %v621_v24 }
 0x11d   : > { %v601_v1 = vpop.f32.mrf.mxu0 }
 0x11e   : > { %v602_v8 = vadd.f32 %v601_v1, %v407_v4  ;;  %v623_v20 = vmul.f32 0.01, %v598_v11  ;;  %vm615_vm5 = vcmp.ge.f32.partialorder %v598_v11, 0.0  ;;  %v630_v29 = vsel %vm614_vm6, %v596_v14, %v622_v22 }
 0x11f   : > { %v603_v3 = vpop.f32.mrf.mxu0 }
 0x120   : > { %v604_v6 = vadd.f32 %v603_v3, %v407_v4  ;;  %v624_v19 = vmul.f32 0.01, %v602_v8  ;;  %vm616_vm4 = vcmp.ge.f32.partialorder %v602_v8, 0.0  ;;  %v631_v28 = vsel %vm615_vm5, %v598_v11, %v623_v20  ;;  %v1847_v11 = vld [vmem:[%s2667_s3 + $0x30] sm:$0xff] }
 0x121   : > { %v607_v5 = vpop.f32.mrf.mxu0 }
 0x122   : > { %v608_v7 = vadd.f32 %v607_v5, %v412_v63  ;;  %v625_v16 = vmul.f32 0.01, %v604_v6  ;;  %vm617_vm3 = vcmp.ge.f32.partialorder %v604_v6, 0.0  ;;  %v632_v27 = vsel %vm616_vm4, %v602_v8, %v624_v19  ;;  %v1845_v8 = vld [vmem:[%s2667_s3 + $0x20] sm:$0xff]  ;;  %v812_v19 = vpop.permute.xlu1 %811 }
 0x123   : > { %v609_v9 = vpop.f32.mrf.mxu0 }
 0x124   : > { %v610_v12 = vadd.f32 %v609_v9, %v412_v63  ;;  %v626_v15 = vmul.f32 0.01, %v608_v7  ;;  %vm618_vm2 = vcmp.ge.f32.partialorder %v608_v7, 0.0  ;;  %v633_v25 = vsel %vm617_vm3, %v604_v6, %v625_v16 }
 0x126   : > { %vm619_vm1 = vcmp.ge.f32.partialorder %v610_v12, 0.0  ;;  %v627_v17 = vmul.f32 0.01, %v610_v12  ;;  %v634_v23 = vsel %vm618_vm2, %v608_v7, %v626_v15 }
 0x128   : > { %v635_v21 = vsel %vm619_vm1, %v610_v12, %v627_v17  ;;  %v1848_v12 = vld [vmem:[%s2667_s3 + $0x38] sm:$0xff]  ;;  %v817_v17 = vpop.permute.xlu0 %816 }
 0x129   : > { %700 = vmatprep.subr.mxu1 %v635_v21 }
 0x12a   : > { %701 = vmatpush1.msra.mxu1 %v634_v23 }
 0x12b   : > { %702 = vmatprep.subr.mxu1 %v633_v25 }
 0x12c   : > { %703 = vmatpush1.msra.mxu1 %v632_v27  ;;  %v807_v24 = vpop.permute.xlu0 %806  ;;  %v802_v27 = vpop.permute.xlu1 %801 }
 0x12d   : > { %704 = vmatprep.subr.mxu1 %v631_v28 }
 0x12e   : > { %705 = vmatpush1.msra.mxu1 %v630_v29 }
 0x12f   : > { %706 = vmatprep.subr.mxu1 %v629_v30 }
 0x130   : > { %707 = vmatpush1.msra.mxu1 %v628_v32 }
 0x131   : > { %1841 = vmatmul.mubr.msk.f32.vlgmr.msra.gmra.mxu1 %vm414_vm0, %v636_v31 }
 0x132   : > { %746 = vmatprep.mubr.f32.mxu1 %v2124_v59 }
 0x135   : > { %1842 = vmatmul.mubr.msk.f32.gmra.mxu1 %vm414_vm0, %v637_v33 }
 0x136   : > { %752 = vmatprep.mubr.f32.mxu1 %v2124_v59 }
 0x139   : > { %1843 = vmatmul.mubr.msk.f32.gmra.mxu1 %vm414_vm0, %v638_v34 }
 0x13a   : > { %758 = vmatprep.mubr.f32.mxu1 %v2124_v59 }
 0x13d   : > { %1844 = vmatmul.mubr.msk.f32.gmra.mxu1 %vm414_vm0, %v639_v35 }
 0x13e   : > { %895 = vmatprep.mubr.f32.mxu1 %v2124_v59 }
 0x1f1   : > { %v742_v36 = vpop.f32.mrf.mxu1 }
 0x1f2   : > { %v743_v58 = vadd.f32 %v742_v36, %v647_v50 }
 0x1f3   : > { %v744_v37 = vpop.f32.mrf.mxu1 }
 0x1f4   : > { %v745_v53 = vadd.f32 %v744_v37, %v647_v50  ;;  %v773_v3 = vmul.f32 0.01, %v743_v58  ;;  %vm765_vm1 = vcmp.ge.f32.partialorder %v743_v58, 0.0  ;;  %v1858_v50 = vld [vmem:[%s2667_s3 + $0x48] sm:$0xff] }
 0x1f5   : > { %v748_v38 = vpop.f32.mrf.mxu1 }
 0x1f6   : > { %v749_v54 = vadd.f32 %v748_v38, %v652_v47  ;;  %v774_v1 = vmul.f32 0.01, %v745_v53  ;;  %vm766_vm15 = vcmp.ge.f32.partialorder %v745_v53, 0.0  ;;  %v781_v9 = vsel %vm765_vm1, %v743_v58, %v773_v3 }
 0x1f7   : > { %v750_v39 = vpop.f32.mrf.mxu1 }
 0x1f8   : > { %v751_v51 = vadd.f32 %v750_v39, %v652_v47  ;;  %v775_v63 = vmul.f32 0.01, %v749_v54  ;;  %vm767_vm14 = vcmp.ge.f32.partialorder %v749_v54, 0.0  ;;  %v782_v7 = vsel %vm766_vm15, %v745_v53, %v774_v1 }
 0x1f9   : > { %v754_v41 = vpop.f32.mrf.mxu1 }
 0x1fa   : > { %v755_v48 = vadd.f32 %v754_v41, %v657_v42  ;;  %v776_v61 = vmul.f32 0.01, %v751_v51  ;;  %vm768_vm13 = vcmp.ge.f32.partialorder %v751_v51, 0.0  ;;  %v783_v6 = vsel %vm767_vm14, %v749_v54, %v775_v63 }
 0x1fb   : > { %v756_v43 = vpop.f32.mrf.mxu1 }
 0x1fc   : > { %v757_v45 = vadd.f32 %v756_v43, %v657_v42  ;;  %v777_v60 = vmul.f32 0.01, %v755_v48  ;;  %vm769_vm12 = vcmp.ge.f32.partialorder %v755_v48, 0.0  ;;  %v784_v5 = vsel %vm768_vm13, %v751_v51, %v776_v61  ;;  %v1859_v51 = vld [vmem:[%s2667_s3 + $0x50] sm:$0xff] }
 0x1fd   : > { %v760_v44 = vpop.f32.mrf.mxu1 }
 0x1fe   : > { %v761_v46 = vadd.f32 %v760_v44, %v662_v40  ;;  %v778_v56 = vmul.f32 0.01, %v757_v45  ;;  %vm770_vm11 = vcmp.ge.f32.partialorder %v757_v45, 0.0  ;;  %v785_v4 = vsel %vm769_vm12, %v755_v48, %v777_v60  ;;  %v1857_v48 = vld [vmem:[%s2667_s3 + $0x40] sm:$0xff]  ;;  %v967_v60 = vpop.permute.xlu1 %966 }
 0x1ff   : > { %v762_v49 = vpop.f32.mrf.mxu1 }
 0x200   : > { %v763_v52 = vadd.f32 %v762_v49, %v662_v40  ;;  %v779_v55 = vmul.f32 0.01, %v761_v46  ;;  %vm771_vm9 = vcmp.ge.f32.partialorder %v761_v46, 0.0  ;;  %v786_v2 = vsel %vm770_vm11, %v757_v45, %v778_v56 }
 0x202   : > { %v780_v57 = vmul.f32 0.01, %v763_v52  ;;  %vm772_vm10 = vcmp.ge.f32.partialorder %v763_v52, 0.0  ;;  %v787_v0 = vsel %vm771_vm9, %v761_v46, %v779_v55 }
 0x204   : > { %v788_v62 = vsel %vm772_vm10, %v763_v52, %v780_v57  ;;  %v1860_v52 = vld [vmem:[%s2667_s3 + $0x58] sm:$0xff]  ;;  %v972_v57 = vpop.permute.xlu0 %971 }
 0x205   : > { %855 = vmatprep.subr.mxu1 %v788_v62 }
 0x206   : > { %856 = vmatpush1.msra.mxu1 %v787_v0 }
 0x207   : > { %857 = vmatprep.subr.mxu1 %v786_v2 }
 0x208   : > { %858 = vmatpush1.msra.mxu1 %v785_v4  ;;  %v962_v1 = vpop.permute.xlu0 %961  ;;  %v957_v4 = vpop.permute.xlu1 %956 }
 0x209   : > { %859 = vmatprep.subr.mxu1 %v784_v5 }
 0x20a   : > { %860 = vmatpush1.msra.mxu1 %v783_v6 }
 0x20b   : > { %861 = vmatprep.subr.mxu1 %v782_v7 }
 0x20c   : > { %862 = vmatpush1.msra.mxu1 %v781_v9 }
 0x20d   : > { %1853 = vmatmul.mubr.msk.f32.vlgmr.msra.gmra.mxu1 %vm414_vm0, %v1845_v8 }
 0x20e   : > { %901 = vmatprep.mubr.f32.mxu1 %v2124_v59 }
 0x211   : > { %1854 = vmatmul.mubr.msk.f32.gmra.mxu1 %vm414_vm0, %v1846_v10 }
 0x212   : > { %907 = vmatprep.mubr.f32.mxu1 %v2124_v59 }
 0x215   : > { %1855 = vmatmul.mubr.msk.f32.gmra.mxu1 %vm414_vm0, %v1847_v11 }
 0x216   : > { %913 = vmatprep.mubr.f32.mxu1 %v2124_v59 }
 0x219   : > { %1856 = vmatmul.mubr.msk.f32.gmra.mxu1 %vm414_vm0, %v1848_v12 }
 0x21a   : > { %1050 = vmatprep.mubr.f32.mxu1 %v2124_v59 }
 0x2cd   : > { %v897_v13 = vpop.f32.mrf.mxu1 }
 0x2ce   : > { %v898_v35 = vadd.f32 %v897_v13, %v802_v27 }
 0x2cf   : > { %v899_v14 = vpop.f32.mrf.mxu1 }
 0x2d0   : > { %v900_v30 = vadd.f32 %v899_v14, %v802_v27  ;;  %v928_v43 = vmul.f32 0.01, %v898_v35  ;;  %vm920_vm9 = vcmp.ge.f32.partialorder %v898_v35, 0.0  ;;  %v1100_v27 = vld [vmem:[%s2669_s5 + $0x8] sm:$0xff] }
 0x2d1   : > { %v903_v15 = vpop.f32.mrf.mxu1 }
 0x2d2   : > { %v904_v31 = vadd.f32 %v903_v15, %v807_v24  ;;  %v929_v41 = vmul.f32 0.01, %v900_v30  ;;  %vm921_vm8 = vcmp.ge.f32.partialorder %v900_v30, 0.0  ;;  %v936_v49 = vsel %vm920_vm9, %v898_v35, %v928_v43 }
 0x2d3   : > { %v905_v16 = vpop.f32.mrf.mxu1 }
 0x2d4   : > { %v906_v28 = vadd.f32 %v905_v16, %v807_v24  ;;  %v930_v39 = vmul.f32 0.01, %v904_v31  ;;  %vm922_vm7 = vcmp.ge.f32.partialorder %v904_v31, 0.0  ;;  %v937_v47 = vsel %vm921_vm8, %v900_v30, %v929_v41 }
 0x2d5   : > { %v909_v18 = vpop.f32.mrf.mxu1 }
 0x2d6   : > { %v910_v25 = vadd.f32 %v909_v18, %v812_v19  ;;  %v931_v37 = vmul.f32 0.01, %v906_v28  ;;  %vm923_vm6 = vcmp.ge.f32.partialorder %v906_v28, 0.0  ;;  %v938_v46 = vsel %vm922_vm7, %v904_v31, %v930_v39 }
 0x2d7   : > { %v911_v20 = vpop.f32.mrf.mxu1 }
 0x2d8   : > { %v912_v22 = vadd.f32 %v911_v20, %v812_v19  ;;  %v932_v36 = vmul.f32 0.01, %v910_v25  ;;  %vm924_vm5 = vcmp.ge.f32.partialorder %v910_v25, 0.0  ;;  %v939_v45 = vsel %vm923_vm6, %v906_v28, %v931_v37  ;;  %v1101_v28 = vld [vmem:[%s2669_s5 + $0x10] sm:$0xff] }
 0x2d9   : > { %v915_v21 = vpop.f32.mrf.mxu1 }
 0x2da   : > { %v916_v23 = vadd.f32 %v915_v21, %v817_v17  ;;  %v933_v33 = vmul.f32 0.01, %v912_v22  ;;  %vm925_vm4 = vcmp.ge.f32.partialorder %v912_v22, 0.0  ;;  %v940_v44 = vsel %vm924_vm5, %v910_v25, %v932_v36  ;;  %v1099_v25 = vld [vmem:[%s2669_s5] sm:$0xff]  ;;  %v1120_v36 = vpop.permute.xlu1 %1119 }
 0x2db   : > { %v917_v26 = vpop.f32.mrf.mxu1 }
 0x2dc   : > { %v918_v29 = vadd.f32 %v917_v26, %v817_v17  ;;  %v934_v32 = vmul.f32 0.01, %v916_v23  ;;  %vm926_vm2 = vcmp.ge.f32.partialorder %v916_v23, 0.0  ;;  %v941_v42 = vsel %vm925_vm4, %v912_v22, %v933_v33 }
 0x2de   : > { %v935_v34 = vmul.f32 0.01, %v918_v29  ;;  %vm927_vm3 = vcmp.ge.f32.partialorder %v918_v29, 0.0  ;;  %v942_v40 = vsel %vm926_vm2, %v916_v23, %v934_v32 }
 0x2e0   : > { %v943_v38 = vsel %vm927_vm3, %v918_v29, %v935_v34  ;;  %v1102_v29 = vld [vmem:[%s2669_s5 + $0x18] sm:$0xff]  ;;  %v1125_v34 = vpop.permute.xlu0 %1124 }
 0x2e1   : > { %1010 = vmatprep.subr.mxu1 %v943_v38 }
 0x2e2   : > { %1011 = vmatpush1.msra.mxu1 %v942_v40 }
 0x2e3   : > { %1012 = vmatprep.subr.mxu1 %v941_v42 }
 0x2e4   : > { %1013 = vmatpush1.msra.mxu1 %v940_v44  ;;  %v1115_v41 = vpop.permute.xlu0 %1114  ;;  %v1110_v44 = vpop.permute.xlu1 %1109 }
 0x2e5   : > { %1014 = vmatprep.subr.mxu1 %v939_v45 }
 0x2e6   : > { %1015 = vmatpush1.msra.mxu1 %v938_v46 }
 0x2e7   : > { %1016 = vmatprep.subr.mxu1 %v937_v47 }
 0x2e8   : > { %1017 = vmatpush1.msra.mxu1 %v936_v49 }
 0x2e9   : > { %1865 = vmatmul.mubr.msk.f32.vlgmr.msra.gmra.mxu1 %vm414_vm0, %v1857_v48 }
 0x2ea   : > { %1056 = vmatprep.mubr.f32.mxu1 %v2124_v59 }
 0x2ed   : > { %1866 = vmatmul.mubr.msk.f32.gmra.mxu1 %vm414_vm0, %v1858_v50 }
 0x2ee   : > { %1062 = vmatprep.mubr.f32.mxu1 %v2124_v59 }
 0x2f1   : > { %1867 = vmatmul.mubr.msk.f32.gmra.mxu1 %vm414_vm0, %v1859_v51 }
 0x2f2   : > { %1068 = vmatprep.mubr.f32.mxu1 %v2124_v59 }
 0x2f5   : > { %1868 = vmatmul.mubr.msk.f32.gmra.mxu1 %vm414_vm0, %v1860_v52 }
 0x2f6   : > { %1203 = vmatprep.mubr.f32.mxu1 %v2124_v59 }
 0x3a9   : > { %v1052_v53 = vpop.f32.mrf.mxu1 }
 0x3aa   : > { %v1053_v12 = vadd.f32 %v1052_v53, %v957_v4 }
 0x3ab   : > { %v1054_v54 = vpop.f32.mrf.mxu1 }
 0x3ac   : > { %v1055_v7 = vadd.f32 %v1054_v54, %v957_v4  ;;  %v1083_v20 = vmul.f32 0.01, %v1053_v12  ;;  %vm1075_vm2 = vcmp.ge.f32.partialorder %v1053_v12, 0.0  ;;  %v1253_v4 = vld [vmem:[%s2671_s7 + $0x8] sm:$0xff] }
 0x3ad   : > { %v1058_v55 = vpop.f32.mrf.mxu1 }
 0x3ae   : > { %v1059_v8 = vadd.f32 %v1058_v55, %v962_v1  ;;  %v1084_v18 = vmul.f32 0.01, %v1055_v7  ;;  %vm1076_vm1 = vcmp.ge.f32.partialorder %v1055_v7, 0.0  ;;  %v1091_v26 = vsel %vm1075_vm2, %v1053_v12, %v1083_v20 }
 0x3af   : > { %v1060_v56 = vpop.f32.mrf.mxu1 }
 0x3b0   : > { %v1061_v5 = vadd.f32 %v1060_v56, %v962_v1  ;;  %v1085_v16 = vmul.f32 0.01, %v1059_v8  ;;  %vm1077_vm15 = vcmp.ge.f32.partialorder %v1059_v8, 0.0  ;;  %v1092_v24 = vsel %vm1076_vm1, %v1055_v7, %v1084_v18 }
 0x3b1   : > { %v1064_v58 = vpop.f32.mrf.mxu1 }
 0x3b2   : > { %v1065_v2 = vadd.f32 %v1064_v58, %v967_v60  ;;  %v1086_v14 = vmul.f32 0.01, %v1061_v5  ;;  %vm1078_vm14 = vcmp.ge.f32.partialorder %v1061_v5, 0.0  ;;  %v1093_v23 = vsel %vm1077_vm15, %v1059_v8, %v1085_v16 }
 0x3b3   : > { %v1066_v61 = vpop.f32.mrf.mxu1 }
 0x3b4   : > { %v1067_v63 = vadd.f32 %v1066_v61, %v967_v60  ;;  %v1087_v13 = vmul.f32 0.01, %v1065_v2  ;;  %vm1079_vm13 = vcmp.ge.f32.partialorder %v1065_v2, 0.0  ;;  %v1094_v22 = vsel %vm1078_vm14, %v1061_v5, %v1086_v14  ;;  %v1259_v5 = vpop.permute.xlu0 %1258 }
 0x3b5   : > { %v1070_v62 = vpop.f32.mrf.mxu1 }
 0x3b6   : > { %v1071_v0 = vadd.f32 %v1070_v62, %v972_v57  ;;  %v1088_v10 = vmul.f32 0.01, %v1067_v63  ;;  %vm1080_vm12 = vcmp.ge.f32.partialorder %v1067_v63, 0.0  ;;  %v1095_v21 = vsel %vm1079_vm13, %v1065_v2, %v1087_v13  ;;  %v1252_v2 = vld [vmem:[%s2671_s7] sm:$0xff] }
 0x3b7   : > { %v1072_v3 = vpop.f32.mrf.mxu1 }
 0x3b8   : > { %v1073_v6 = vadd.f32 %v1072_v3, %v972_v57  ;;  %v1089_v9 = vmul.f32 0.01, %v1071_v0  ;;  %vm1081_vm10 = vcmp.ge.f32.partialorder %v1071_v0, 0.0  ;;  %v1096_v19 = vsel %vm1080_vm12, %v1067_v63, %v1088_v10 }
 0x3ba   : > { %v1090_v11 = vmul.f32 0.01, %v1073_v6  ;;  %vm1082_vm11 = vcmp.ge.f32.partialorder %v1073_v6, 0.0  ;;  %v1097_v17 = vsel %vm1081_vm10, %v1071_v0, %v1089_v9 }
 0x3bc   : > { %v1098_v15 = vsel %vm1082_vm11, %v1073_v6, %v1090_v11  ;;  %v1264_v11 = vpop.permute.xlu1 %1263 }
 0x3bd   : > { %1163 = vmatprep.subr.mxu1 %v1098_v15 }
 0x3be   : > { %1164 = vmatpush1.msra.mxu1 %v1097_v17 }
 0x3bf   : > { %1165 = vmatprep.subr.mxu1 %v1096_v19 }
 0x3c0   : > { %1166 = vmatpush1.msra.mxu1 %v1095_v21 }
 0x3c1   : > { %1167 = vmatprep.subr.mxu1 %v1094_v22 }
 0x3c2   : > { %1168 = vmatpush1.msra.mxu1 %v1093_v23 }
 0x3c3   : > { %1169 = vmatprep.subr.mxu1 %v1092_v24 }
 0x3c4   : > { %1170 = vmatpush1.msra.mxu1 %v1091_v26 }
 0x3c5   : > { %1869 = vmatmul.mubr.msk.f32.vlgmr.msra.gmra.mxu1 %vm414_vm0, %v1099_v25 }
 0x3c6   : > { %1209 = vmatprep.mubr.f32.mxu1 %v2124_v59 }
 0x3c9   : > { %1870 = vmatmul.mubr.msk.f32.gmra.mxu1 %vm414_vm0, %v1100_v27 }
 0x3ca   : > { %1215 = vmatprep.mubr.f32.mxu1 %v2124_v59 }
 0x3cd   : > { %1871 = vmatmul.mubr.msk.f32.gmra.mxu1 %vm414_vm0, %v1101_v28 }
 0x3ce   : > { %1221 = vmatprep.mubr.f32.mxu1 %v2124_v59 }
 0x3d1   : > { %1872 = vmatmul.mubr.msk.f32.gmra.mxu1 %vm414_vm0, %v1102_v29 }
 0x3d2   : > { %1336 = vmatprep.mubr.f32.mxu1 %v2124_v59 }
 0x485   : > { %v1205_v30 = vpop.f32.mrf.mxu1 }
 0x486   : > { %v1206_v52 = vadd.f32 %v1205_v30, %v1110_v44 }
 0x487   : > { %v1207_v31 = vpop.f32.mrf.mxu1 }
 0x488   : > { %v1208_v47 = vadd.f32 %v1207_v31, %v1110_v44  ;;  %v1236_v61 = vmul.f32 0.01, %v1206_v52  ;;  %vm1228_vm10 = vcmp.ge.f32.partialorder %v1206_v52, 0.0 }
 0x489   : > { %v1211_v32 = vpop.f32.mrf.mxu1 }
 0x48a   : > { %v1212_v48 = vadd.f32 %v1211_v32, %v1115_v41  ;;  %v1237_v58 = vmul.f32 0.01, %v1208_v47  ;;  %vm1229_vm9 = vcmp.ge.f32.partialorder %v1208_v47, 0.0  ;;  %v1244_v3 = vsel %vm1228_vm10, %v1206_v52, %v1236_v61 }
 0x48b   : > { %v1213_v33 = vpop.f32.mrf.mxu1 }
 0x48c   : > { %v1214_v45 = vadd.f32 %v1213_v33, %v1115_v41  ;;  %v1238_v56 = vmul.f32 0.01, %v1212_v48  ;;  %vm1230_vm8 = vcmp.ge.f32.partialorder %v1212_v48, 0.0  ;;  %v1245_v1 = vsel %vm1229_vm9, %v1208_v47, %v1237_v58 }
 0x48d   : > { %v1217_v35 = vpop.f32.mrf.mxu1 }
 0x48e   : > { %v1218_v42 = vadd.f32 %v1217_v35, %v1120_v36  ;;  %v1239_v54 = vmul.f32 0.01, %v1214_v45  ;;  %vm1231_vm7 = vcmp.ge.f32.partialorder %v1214_v45, 0.0  ;;  %v1246_v0 = vsel %vm1230_vm8, %v1212_v48, %v1238_v56 }
 0x48f   : > { %v1219_v37 = vpop.f32.mrf.mxu1 }
 0x490   : > { %v1220_v39 = vadd.f32 %v1219_v37, %v1120_v36  ;;  %v1240_v53 = vmul.f32 0.01, %v1218_v42  ;;  %vm1232_vm6 = vcmp.ge.f32.partialorder %v1218_v42, 0.0  ;;  %v1247_v63 = vsel %vm1231_vm7, %v1214_v45, %v1239_v54 }
 0x491   : > { %v1223_v38 = vpop.f32.mrf.mxu1 }
 0x492   : > { %v1224_v40 = vadd.f32 %v1223_v38, %v1125_v34  ;;  %v1241_v50 = vmul.f32 0.01, %v1220_v39  ;;  %vm1233_vm5 = vcmp.ge.f32.partialorder %v1220_v39, 0.0  ;;  %v1248_v62 = vsel %vm1232_vm6, %v1218_v42, %v1240_v53 }
 0x493   : > { %v1225_v43 = vpop.f32.mrf.mxu1 }
 0x494   : > { %v1226_v46 = vadd.f32 %v1225_v43, %v1125_v34  ;;  %v1242_v49 = vmul.f32 0.01, %v1224_v40  ;;  %vm1234_vm3 = vcmp.ge.f32.partialorder %v1224_v40, 0.0  ;;  %v1249_v60 = vsel %vm1233_vm5, %v1220_v39, %v1241_v50 }
 0x496   : > { %v1243_v51 = vmul.f32 0.01, %v1226_v46  ;;  %vm1235_vm4 = vcmp.ge.f32.partialorder %v1226_v46, 0.0  ;;  %v1250_v57 = vsel %vm1234_vm3, %v1224_v40, %v1242_v49 }
 0x498   : > { %v1251_v55 = vsel %vm1235_vm4, %v1226_v46, %v1243_v51 }
 0x499   : > { %1296 = vmatprep.subr.mxu1 %v1251_v55 }
 0x49a   : > { %1297 = vmatpush1.msra.mxu1 %v1250_v57 }
 0x49b   : > { %1298 = vmatprep.subr.mxu1 %v1249_v60 }
 0x49c   : > { %1299 = vmatpush1.msra.mxu1 %v1248_v62 }
 0x49d   : > { %1300 = vmatprep.subr.mxu1 %v1247_v63 }
 0x49e   : > { %1301 = vmatpush1.msra.mxu1 %v1246_v0 }
 0x49f   : > { %1302 = vmatprep.subr.mxu1 %v1245_v1 }
 0x4a0   : > { %1303 = vmatpush1.msra.mxu1 %v1244_v3 }
 0x4a1   : > { %1873 = vmatmul.mubr.msk.f32.vlgmr.msra.gmra.mxu1 %vm414_vm0, %v1252_v2 }
 0x4a2   : > { %1342 = vmatprep.mubr.f32.mxu1 %v2124_v59 }
 0x4a5   : > { %1874 = vmatmul.mubr.msk.f32.gmra.mxu1 %vm414_vm0, %v1253_v4  ;;  %vm1425_vm0 = vcmask 130048  }
 0x561   : > { %v1338_v6 = vpop.f32.mrf.mxu1 }
 0x562   : > { %v1339_v7 = vadd.f32 %v1338_v6, %v1259_v5 }
 0x563   : > { %v1340_v8 = vpop.f32.mrf.mxu1 }
 0x564   : > { %v1349_v9 = vmul.f32 1.5, %v1339_v7  ;;  %v1341_v10 = vadd.f32 %v1340_v8, %v1259_v5 }
 0x565   : > { %v1344_v12 = vpop.f32.mrf.mxu1 }
 0x566   : > { %2027 = vtanh.f32 %v1349_v9  ;;  %v1350_v13 = vmul.f32 1.5, %v1341_v10  ;;  %v1345_v14 = vadd.f32 %v1344_v12, %v1264_v11 }
 0x567   : > { %v1346_v15 = vpop.f32.mrf.mxu1 }
 0x568   : > { %2029 = vtanh.f32 %v1350_v13  ;;  %v1351_v59 = vmul.f32 1.5, %v1345_v14  ;;  %v1347_v16 = vadd.f32 %v1346_v15, %v1264_v11 }
 0x56a   : > { %2031 = vtanh.f32 %v1351_v59  ;;  %v1352_v17 = vmul.f32 1.5, %v1347_v16 }
 0x56c   : > { %2033 = vtanh.f32 %v1352_v17 }
 0x573   : > { %v2028_v18 = vpop.eup %2027 }
 0x574   : > { %v1357_v19 = vmul.f32 2.0, %v2028_v18 }
 0x575   : > { %v2030_v20 = vpop.eup %2029 }
 0x576   : > { %1361 = vxpose.xlu0.b32.start [1/2] (short) %v1357_v19, 128  ;;  %v1358_v21 = vmul.f32 2.0, %v2030_v20 }
 0x577   : > { %v2032_v22 = vpop.eup %2031 }
 0x578   : > { %v1359_v23 = vmul.f32 2.0, %v2032_v22  ;;  %1393 = vxpose.xlu1.b32.start [1/2] (short) %v1358_v21, 128 }
 0x579   : > { %v2034_v24 = vpop.eup %2033 }
 0x57a   : > { %v1360_v25 = vmul.f32 2.0, %v2034_v24  ;;  %1362 = vxpose.xlu0.b32.end [2/2] (short) %v1359_v23, 128 }
 0x57c   : > { %1394 = vxpose.xlu1.b32.end [2/2] (short) %v1360_v25, 128 }
 0x5f2   : > { %v1377_v26 = vpop.trf.xlu0 }
 0x5f3   : > { %1426 = vst.msk [vmem:[%s2459_s15] sm:$0xff] %vm1425_vm0, %v1377_v26 }
 0x5f4   : > { %v1409_v27 = vpop.trf.xlu1 }
 0x5f5   : > { %1442 = vst.msk [vmem:[%s2459_s15 + $0x80] sm:$0xff] %vm1425_vm0, %v1409_v27 }
 0x5f6   : > { %v1378_v28 = vpop.trf.xlu0 }
 0x5f7   : > { %1427 = vst.msk [vmem:[%s2459_s15 + $0x8] sm:$0xff] %vm1425_vm0, %v1378_v28 }
 0x5f8   : > { %v1410_v29 = vpop.trf.xlu1 }
 0x5f9   : > { %1443 = vst.msk [vmem:[%s2459_s15 + $0x88] sm:$0xff] %vm1425_vm0, %v1410_v29 }
 0x5fa   : > { %v1379_v30 = vpop.trf.xlu0 }
 0x5fb   : > { %1428 = vst.msk [vmem:[%s2459_s15 + $0x10] sm:$0xff] %vm1425_vm0, %v1379_v30 }
 0x5fc   : > { %v1411_v31 = vpop.trf.xlu1 }
 0x5fd   : > { %1444 = vst.msk [vmem:[%s2459_s15 + $0x90] sm:$0xff] %vm1425_vm0, %v1411_v31 }
 0x5fe   : > { %v1380_v32 = vpop.trf.xlu0 }
 0x5ff   : > { %1429 = vst.msk [vmem:[%s2459_s15 + $0x18] sm:$0xff] %vm1425_vm0, %v1380_v32 }
 0x600   : > { %v1412_v33 = vpop.trf.xlu1 }
 0x601   : > { %1445 = vst.msk [vmem:[%s2459_s15 + $0x98] sm:$0xff] %vm1425_vm0, %v1412_v33 }
 0x602   : > { %v1381_v34 = vpop.trf.xlu0 }
 0x603   : > { %1430 = vst.msk [vmem:[%s2459_s15 + $0x20] sm:$0xff] %vm1425_vm0, %v1381_v34 }
 0x604   : > { %v1413_v35 = vpop.trf.xlu1 }
 0x605   : > { %1446 = vst.msk [vmem:[%s2459_s15 + $0xa0] sm:$0xff] %vm1425_vm0, %v1413_v35 }
 0x606   : > { %v1382_v36 = vpop.trf.xlu0 }
 0x607   : > { %1431 = vst.msk [vmem:[%s2459_s15 + $0x28] sm:$0xff] %vm1425_vm0, %v1382_v36 }
 0x608   : > { %v1414_v37 = vpop.trf.xlu1 }
 0x609   : > { %1447 = vst.msk [vmem:[%s2459_s15 + $0xa8] sm:$0xff] %vm1425_vm0, %v1414_v37 }
 0x60a   : > { %v1383_v38 = vpop.trf.xlu0 }
 0x60b   : > { %1432 = vst.msk [vmem:[%s2459_s15 + $0x30] sm:$0xff] %vm1425_vm0, %v1383_v38 }
 0x60c   : > { %v1415_v39 = vpop.trf.xlu1 }
 0x60d   : > { %1448 = vst.msk [vmem:[%s2459_s15 + $0xb0] sm:$0xff] %vm1425_vm0, %v1415_v39 }
 0x60e   : > { %v1384_v40 = vpop.trf.xlu0 }
 0x60f   : > { %1433 = vst.msk [vmem:[%s2459_s15 + $0x38] sm:$0xff] %vm1425_vm0, %v1384_v40 }
 0x610   : > { %v1416_v41 = vpop.trf.xlu1 }
 0x611   : > { %1449 = vst.msk [vmem:[%s2459_s15 + $0xb8] sm:$0xff] %vm1425_vm0, %v1416_v41 }
 0x612   : > { %v1385_v42 = vpop.trf.xlu0 }
 0x613   : > { %1434 = vst.msk [vmem:[%s2459_s15 + $0x40] sm:$0xff] %vm1425_vm0, %v1385_v42 }
 0x614   : > { %v1417_v43 = vpop.trf.xlu1 }
 0x615   : > { %1450 = vst.msk [vmem:[%s2459_s15 + $0xc0] sm:$0xff] %vm1425_vm0, %v1417_v43 }
 0x616   : > { %v1386_v44 = vpop.trf.xlu0 }
 0x617   : > { %1435 = vst.msk [vmem:[%s2459_s15 + $0x48] sm:$0xff] %vm1425_vm0, %v1386_v44 }
 0x618   : > { %v1418_v45 = vpop.trf.xlu1 }
 0x619   : > { %1451 = vst.msk [vmem:[%s2459_s15 + $0xc8] sm:$0xff] %vm1425_vm0, %v1418_v45 }
 0x61a   : > { %v1387_v46 = vpop.trf.xlu0 }
 0x61b   : > { %1436 = vst.msk [vmem:[%s2459_s15 + $0x50] sm:$0xff] %vm1425_vm0, %v1387_v46 }
 0x61c   : > { %v1419_v47 = vpop.trf.xlu1 }
 0x61d   : > { %1452 = vst.msk [vmem:[%s2459_s15 + $0xd0] sm:$0xff] %vm1425_vm0, %v1419_v47 }
 0x61e   : > { %v1388_v48 = vpop.trf.xlu0 }
 0x61f   : > { %1437 = vst.msk [vmem:[%s2459_s15 + $0x58] sm:$0xff] %vm1425_vm0, %v1388_v48 }
 0x620   : > { %v1420_v49 = vpop.trf.xlu1 }
 0x621   : > { %1453 = vst.msk [vmem:[%s2459_s15 + $0xd8] sm:$0xff] %vm1425_vm0, %v1420_v49 }
 0x622   : > { %v1389_v50 = vpop.trf.xlu0 }
 0x623   : > { %1438 = vst.msk [vmem:[%s2459_s15 + $0x60] sm:$0xff] %vm1425_vm0, %v1389_v50 }
 0x624   : > { %v1421_v51 = vpop.trf.xlu1 }
 0x625   : > { %1454 = vst.msk [vmem:[%s2459_s15 + $0xe0] sm:$0xff] %vm1425_vm0, %v1421_v51 }
 0x626   : > { %v1390_v52 = vpop.trf.xlu0 }
 0x627   : > { %1439 = vst.msk [vmem:[%s2459_s15 + $0x68] sm:$0xff] %vm1425_vm0, %v1390_v52 }
 0x628   : > { %v1422_v53 = vpop.trf.xlu1 }
 0x629   : > { %1455 = vst.msk [vmem:[%s2459_s15 + $0xe8] sm:$0xff] %vm1425_vm0, %v1422_v53 }
 0x62a   : > { %v1391_v54 = vpop.trf.xlu0 }
 0x62b   : > { %1440 = vst.msk [vmem:[%s2459_s15 + $0x70] sm:$0xff] %vm1425_vm0, %v1391_v54 }
 0x62c   : > { %v1423_v55 = vpop.trf.xlu1 }
 0x62d   : > { %1456 = vst.msk [vmem:[%s2459_s15 + $0xf0] sm:$0xff] %vm1425_vm0, %v1423_v55  ;;  %1464 = sbr.rel (!%p2200_p4) target bundleno = 1634 (0x662), region = 60 }
 0x62e   : > { %v1392_v56 = vpop.trf.xlu0 }
 0x62f   : > { %1441 = vst.msk [vmem:[%s2459_s15 + $0x78] sm:$0xff] %vm1425_vm0, %v1392_v56 }
 0x630   : > { %v1424_v57 = vpop.trf.xlu1 }
 0x631   : > { %1457 = vst.msk [vmem:[%s2459_s15 + $0xf8] sm:$0xff] %vm1425_vm0, %v1424_v57 }
 0x632   : > { %s2684_s30 = smov (!%p1467_p8, %s1466_s30), 32 }
 0x633   : > { %s1877_s23 = sshll.u32 %s2684_s30, 7 }
 0x634   : > { %p1880_p9 = scmp.eq.s32.totalorder %s1877_s23, 0 }
 0x635   : > { %s2538_s24 = sshrl.u32 (!%p1880_p9), %s2684_s30, 5 }
 0x636   : > { %1475 = sbr.rel (%p1880_p9) target bundleno = 1634 (0x662), region = 64  ;;  %p1881_p10 = scmp.le.s32.totalorder (!%p1880_p9), %s2538_s24, 0 }
 0x63b   : > { %1754 = sbr.rel (%p1881_p10) target bundleno = 1617 (0x651), region = 144  ;;  %s2675_s12 = smov (!%p1881_p10), %s2532_s22 }
 0x63c   : > { %s2676_s17 = smov (!%p1881_p10), %s2459_s15  ;;  %s2547_s18 = smov (!%p1881_p10), 0  }
 0x63d   : > { %s2549_s25 = smov (!%p1881_p10), 0  }
 0x640 LB: >> { %v1600_v58 = vld [vmem:[%s2097_s17] sm:$0xff]  ;;  %v1602_v60 = vld [vmem:[%s2097_s17 + $0x8] sm:$0xff]  ;;  %v1604_v61 = vld [vmem:[%s2097_s17 + $0x10] sm:$0xff]  ;;  %s1664_s26 = sadd.s32 1, %s2101_s18  ;;  %s1594_s25 = sadd.s32 1, %s2105_s25   ;;  %s2105_s25 = sphi %s2549_s25, %s1594_s25   ;;  %s2101_s18 = sphi %s2547_s18, %s2679_s18   ;;  %s2097_s17 = sphi %s2676_s17, %s2678_s17   ;;  %s2093_s12 = sphi %s2675_s12, %s2677_s12  }
 0x641   : >> { %1601 = vst [vmem:[%s2093_s12] sm:$0xff] %v1600_v58  ;;  %1603 = vst [vmem:[%s2093_s12 + $0x8] sm:$0xff] %v1602_v60  ;;  %v1606_v62 = vld [vmem:[%s2097_s17 + $0x18] sm:$0xff]  ;;  %v1608_v63 = vld [vmem:[%s2097_s17 + $0x20] sm:$0xff]  ;;  %p1665_p11 = scmp.ge.s32.totalorder %s1664_s26, %s2538_s24  ;;  %p1593_p12 = scmp.ge.s32.totalorder %s1594_s25, %s2538_s24 }
 0x642   : >> { %1605 = vst [vmem:[%s2093_s12 + $0x10] sm:$0xff] %v1604_v61  ;;  %v1610_v0 = vld [vmem:[%s2097_s17 + $0x28] sm:$0xff]  ;;  %1607 = vst [vmem:[%s2093_s12 + $0x18] sm:$0xff] %v1606_v62  ;;  %v1612_v1 = vld [vmem:[%s2097_s17 + $0x30] sm:$0xff] }
 0x643   : >> { %1609 = vst [vmem:[%s2093_s12 + $0x20] sm:$0xff] %v1608_v63  ;;  %1611 = vst [vmem:[%s2093_s12 + $0x28] sm:$0xff] %v1610_v0  ;;  %v1614_v2 = vld [vmem:[%s2097_s17 + $0x38] sm:$0xff]  ;;  %v1616_v3 = vld [vmem:[%s2097_s17 + $0x40] sm:$0xff]  ;;  %s2686_s26 = smov (%p1665_p11, %s1664_s26), 0 }
 0x644   : >> { %1613 = vst [vmem:[%s2093_s12 + $0x30] sm:$0xff] %v1612_v1  ;;  %1615 = vst [vmem:[%s2093_s12 + $0x38] sm:$0xff] %v1614_v2  ;;  %v1618_v4 = vld [vmem:[%s2097_s17 + $0x48] sm:$0xff]  ;;  %v1620_v5 = vld [vmem:[%s2097_s17 + $0x50] sm:$0xff]  ;;  %s1882_s27 = sshll.u32 %s2686_s26, 8  ;;  %s2679_s18 = smov %s2686_s26 }
 0x645   : >> { %1617 = vst [vmem:[%s2093_s12 + $0x40] sm:$0xff] %v1616_v3  ;;  %v1622_v6 = vld [vmem:[%s2097_s17 + $0x58] sm:$0xff]  ;;  %1619 = vst [vmem:[%s2093_s12 + $0x48] sm:$0xff] %v1618_v4  ;;  %v1624_v7 = vld [vmem:[%s2097_s17 + $0x60] sm:$0xff]  ;;  %s2605_s28 = scalar_lea.vmem %s2459_s15, %s1882_s27 [#allocation2]   ;;  %s1670_s29 = scalar_lea.vmem %s2532_s22, %s1882_s27  }
 0x646   : >> { %1621 = vst [vmem:[%s2093_s12 + $0x50] sm:$0xff] %v1620_v5  ;;  %1623 = vst [vmem:[%s2093_s12 + $0x58] sm:$0xff] %v1622_v6  ;;  %v1626_v8 = vld [vmem:[%s2097_s17 + $0x68] sm:$0xff]  ;;  %v1628_v9 = vld [vmem:[%s2097_s17 + $0x70] sm:$0xff] }
 0x647   : >> { %1625 = vst [vmem:[%s2093_s12 + $0x60] sm:$0xff] %v1624_v7  ;;  %1627 = vst [vmem:[%s2093_s12 + $0x68] sm:$0xff] %v1626_v8  ;;  %v1630_v10 = vld [vmem:[%s2097_s17 + $0x78] sm:$0xff]  ;;  %v1632_v11 = vld [vmem:[%s2097_s17 + $0x80] sm:$0xff] }
 0x648   : >> { %1629 = vst [vmem:[%s2093_s12 + $0x70] sm:$0xff] %v1628_v9  ;;  %v1634_v12 = vld [vmem:[%s2097_s17 + $0x88] sm:$0xff]  ;;  %1631 = vst [vmem:[%s2093_s12 + $0x78] sm:$0xff] %v1630_v10  ;;  %v1636_v13 = vld [vmem:[%s2097_s17 + $0x90] sm:$0xff] }
 0x649   : >> { %1633 = vst [vmem:[%s2093_s12 + $0x80] sm:$0xff] %v1632_v11  ;;  %1635 = vst [vmem:[%s2093_s12 + $0x88] sm:$0xff] %v1634_v12  ;;  %v1638_v14 = vld [vmem:[%s2097_s17 + $0x98] sm:$0xff]  ;;  %v1640_v15 = vld [vmem:[%s2097_s17 + $0xa0] sm:$0xff] }
 0x64a   : >> { %1637 = vst [vmem:[%s2093_s12 + $0x90] sm:$0xff] %v1636_v13  ;;  %1639 = vst [vmem:[%s2093_s12 + $0x98] sm:$0xff] %v1638_v14  ;;  %v1642_v59 = vld [vmem:[%s2097_s17 + $0xa8] sm:$0xff]  ;;  %v1644_v16 = vld [vmem:[%s2097_s17 + $0xb0] sm:$0xff] }
 0x64b   : >> { %1641 = vst [vmem:[%s2093_s12 + $0xa0] sm:$0xff] %v1640_v15  ;;  %v1646_v17 = vld [vmem:[%s2097_s17 + $0xb8] sm:$0xff]  ;;  %1643 = vst [vmem:[%s2093_s12 + $0xa8] sm:$0xff] %v1642_v59  ;;  %v1648_v18 = vld [vmem:[%s2097_s17 + $0xc0] sm:$0xff] }
 0x64c   : >> { %1645 = vst [vmem:[%s2093_s12 + $0xb0] sm:$0xff] %v1644_v16  ;;  %1647 = vst [vmem:[%s2093_s12 + $0xb8] sm:$0xff] %v1646_v17  ;;  %v1650_v19 = vld [vmem:[%s2097_s17 + $0xc8] sm:$0xff]  ;;  %v1652_v20 = vld [vmem:[%s2097_s17 + $0xd0] sm:$0xff]  ;;  %1596 = sbr.rel (!%p1593_p12) target bundleno = 1600 (0x640), region = 150 }
 0x64d   : >> { %1649 = vst [vmem:[%s2093_s12 + $0xc0] sm:$0xff] %v1648_v18  ;;  %1651 = vst [vmem:[%s2093_s12 + $0xc8] sm:$0xff] %v1650_v19  ;;  %v1654_v21 = vld [vmem:[%s2097_s17 + $0xd8] sm:$0xff]  ;;  %v1656_v22 = vld [vmem:[%s2097_s17 + $0xe0] sm:$0xff] }
 0x64e   : >> { %1653 = vst [vmem:[%s2093_s12 + $0xd0] sm:$0xff] %v1652_v20  ;;  %v1658_v23 = vld [vmem:[%s2097_s17 + $0xe8] sm:$0xff]  ;;  %1655 = vst [vmem:[%s2093_s12 + $0xd8] sm:$0xff] %v1654_v21  ;;  %v1660_v24 = vld [vmem:[%s2097_s17 + $0xf0] sm:$0xff] }
 0x64f   : >> { %1657 = vst [vmem:[%s2093_s12 + $0xe0] sm:$0xff] %v1656_v22  ;;  %1659 = vst [vmem:[%s2093_s12 + $0xe8] sm:$0xff] %v1658_v23  ;;  %v1662_v25 = vld [vmem:[%s2097_s17 + $0xf8] sm:$0xff]  ;;  %s2678_s17 = smov %s2605_s28 }
 0x650   : >> { %1661 = vst [vmem:[%s2093_s12 + $0xf0] sm:$0xff] %v1660_v24  ;;  %1663 = vst [vmem:[%s2093_s12 + $0xf8] sm:$0xff] %v1662_v25  ;;  %s2677_s12 = smov %s1670_s29 }
 0x651 PF: > { %s2646_s11 = sand.u32 31, %s2684_s30   ;;  %s1893_s14 = sshll.u32 %s2538_s24, 8 }
 0x652   : > { %s1675_s20 = scalar_lea.vmem %s2459_s15, %s1893_s14 [#allocation2]   ;;  %s1677_s19 = scalar_lea.vmem %s2532_s22, %s1893_s14  }
 0x653   : > { %p1887_p13 = scmp.le.s32.totalorder %s2646_s11, 0 }
 0x654   : > { %s2107_s21 = smov (!%p1887_p13), %s1677_s19   ;;  %s2111_s23 = smov (!%p1887_p13), %s1675_s20  }
 0x655   : > { %1768 = sbr.rel (%p1887_p13) target bundleno = 1634 (0x662), region = 155  ;;  %s2115_s27 = smov (!%p1887_p13), 0  }
 0x656   : > { %s2119_s26 = smov (!%p1887_p13), 0  }
 0x65a LB: >> { %v1687_v26 = vld [vmem:[%s2113_s23] sm:$0xff]  ;;  %s1689_s30 = sadd.s32 1, %s2117_s27  ;;  %s1681_s26 = sadd.s32 1, %s2121_s26   ;;  %s2121_s26 = sphi %s2119_s26, %s1681_s26   ;;  %s2117_s27 = sphi %s2115_s27, %s2116_s27   ;;  %s2113_s23 = sphi %s2111_s23, %s1694_s23   ;;  %s2109_s21 = sphi %s2107_s21, %s1695_s21  }
 0x65b   : >> { %1688 = vst [vmem:[%s2109_s21] sm:$0xff] %v1687_v26  ;;  %p1690_p0 = scmp.ge.s32.totalorder %s1689_s30, %s2646_s11  ;;  %p1680_p1 = scmp.ge.s32.totalorder %s1681_s26, %s2646_s11 }
 0x65d   : >> { %s2688_s30 = smov (%p1690_p0, %s1689_s30), 0  ;;  %1683 = sbr.rel (!%p1680_p1) target bundleno = 1626 (0x65a), region = 161 }
 0x65e   : >> { %s1888_s15 = sshll.u32 %s2688_s30, 3  ;;  %s2116_s27 = smov %s2688_s30  }
 0x65f   : >> { %s1694_s23 = scalar_lea.vmem %s1675_s20, %s1888_s15 [#allocation2]   ;;  %s1695_s21 = scalar_lea.vmem %s1677_s19, %s1888_s15  }
 0x662 PF: > { %p16_p2 = scmp.ge.s32.totalorder %s2190_s13, 4   ;;  %s2680_s30 = smov %s2085_s10 }
 0x663   : > { %s2681_s10 = smov %s2198_s16  ;;  %s2682_s11 = smov %s2190_s13 }
 0x664   :  { %18 = sbr.rel (!%p16_p2) target bundleno = 2 (0x2), region = 172 }

</bundles_post_ra>
